<compile_context>
chip_gen: v5e
topology: v5e:2x2
jax: 0.10.0
libtpu: 0.0.40
codegen_flags: <defaults>
</compile_context>

<pallas_src>
import jax
import jax.numpy as jnp
from jax import lax
from jax.experimental import pallas as pl
from jax.experimental.pallas import tpu as pltpu


def _round_up(x, m):
    return ((x + m - 1) // m) * m


def decoder_kernel(ids_ref,                         # (T,) int32 scalar-prefetch (SMEM)
                   emb_ref,                         # (1, 1, H) f32  embedding row of ids[t]
                   h0_ref,                          # (1, H)    f32  initial hidden (resident)
                   enc_ref,                         # (S, H)    f32  encoder outputs (resident)
                   wce_ref, wca_ref,                # (H, H)    bf16 attn_combine halves
                   wgi_ref, wgh_ref,                # (H, 3H)   bf16 fused GRU gate weights
                   wout_ref,                        # (H, LV)   bf16 out proj (V zero-padded)
                   b_ref,                           # (4, BL)   f32  bias slab
                   logp_ref,                        # (1, 8, LV) f32 per-step output slab
                   hfin_ref,                        # (1, H)    f32  final hidden (resident)
                   h_scr, ctx_scr):                 # VMEM scratch: hidden carry, context
    del ids_ref  # consumed only by the index_maps
    H = h0_ref.shape[1]
    S = enc_ref.shape[0]
    LV = wout_ref.shape[1]
    t = pl.program_id(0)

    @pl.when(t == 0)
    def _init():
        h_scr[...] = h0_ref[...]
        # Degenerate attention (Linear(2H -> 1) score broadcast over the
        # sequence) => uniform softmax => context = mean of encoder outputs,
        # constant across all decode steps.
        ctx_scr[...] = jnp.sum(enc_ref[...], axis=0, keepdims=True) * (1.0 / S)

    hid = h_scr[...]                                 # (1, H) f32
    emb = emb_ref[0]                                 # (1, H) f32 (dropout = identity, eval)
    ctx = ctx_scr[...]                               # (1, H) f32

    def mm(a, w_ref):                                # bf16 x bf16 -> f32 on the MXU
        return jnp.dot(a.astype(jnp.bfloat16), w_ref[...],
                       preferred_element_type=jnp.float32)

    # --- attn_combine(cat(emb, ctx)) + ReLU : two matmul-accumulates, no lane concat ---
    x = jnp.maximum(mm(emb, wce_ref) + mm(ctx, wca_ref) + b_ref[0:1, 0:H], 0.0)

    # --- GRU cell: fused [Wir|Wiz|Win] and [Whr|Whz|Whn] matmuls (no zero blocks) ---
    gi = mm(x, wgi_ref) + b_ref[1:2, 0:3 * H]        # [rx + br | zx + bz | nx + b_in]
    gh = mm(hid, wgh_ref) + b_ref[2:3, 0:3 * H]      # [rh      | zh      | nh + b_hn]
    r = jax.nn.sigmoid(gi[:, 0:H] + gh[:, 0:H])
    z = jax.nn.sigmoid(gi[:, H:2 * H] + gh[:, H:2 * H])
    n = jnp.tanh(gi[:, 2 * H:3 * H] + r * gh[:, 2 * H:3 * H])
    hnew = (1.0 - z) * n + z * hid                   # (1, H)

    # --- out Linear + log_softmax ; padded vocab columns carry a -1e30 bias ---
    lo = mm(hnew, wout_ref) + b_ref[3:4, 0:LV]       # (1, LV)
    sh = lo - jnp.max(lo, axis=-1, keepdims=True)
    logp = sh - jnp.log(jnp.sum(jnp.exp(sh), axis=-1, keepdims=True))

    # --- carry state + outputs (full, unmasked stores) ---
    h_scr[...] = hnew
    hfin_ref[...] = hnew                             # constant block -> written back at end
    logp_ref[...] = jnp.broadcast_to(logp.reshape(1, 1, LV), logp_ref.shape)


def pack_params(p):
    """Fuse / pad / quantize the PyTorch-layout params once, reused every decode."""
    H = p["wc_e"].shape[0]
    V = p["wout"].shape[1]
    bf16 = jnp.bfloat16
    LV = _round_up(max(V, 128), 128)                 # lane-dense out-proj width
    BL = _round_up(max(3 * H, LV, 128), 128)         # bias slab width

    emb3d = p["embedding"].reshape(V, 1, H).astype(jnp.float32)   # row gathered in-kernel

    wce = p["wc_e"].astype(bf16)                                  # (H, H)
    wca = p["wc_a"].astype(bf16)                                  # (H, H)
    wgi = jnp.concatenate([p["wir"], p["wiz"], p["win"]], axis=1).astype(bf16)   # (H, 3H)
    wgh = jnp.concatenate([p["whr"], p["whz"], p["whn"]], axis=1).astype(bf16)   # (H, 3H)
    w_out = jnp.zeros((H, LV), jnp.float32).at[:, :V].set(p["wout"]).astype(bf16)

    def _row(v, fill=0.0):
        out = jnp.full((1, BL), fill, jnp.float32)
        return out.at[:, :v.shape[1]].set(v)

    bias = jnp.concatenate([
        _row(p["bc"]),
        _row(jnp.concatenate([p["bir"] + p["bhr"], p["biz"] + p["bhz"], p["bn"]], axis=1)),
        _row(jnp.concatenate([jnp.zeros((1, 2 * H), jnp.float32), p["bhn"]], axis=1)),
        _row(p["bout"], fill=-1e30),                 # -1e30 on padded vocab columns
    ], axis=0)                                       # (4, BL) f32

    return {"emb3d": emb3d, "wce": wce, "wca": wca, "wgi": wgi, "wgh": wgh,
            "w_out": w_out, "bias": bias, "hidden_size": H, "vocab_size": V}


def attn_decoder_decode(packed, input_ids, hidden, encoder_outputs):
    """Runs T teacher-forced AttnDecoderRNN.forward steps inside ONE kernel.

    Returns (log_probs (T, V), final hidden (1, 1, H), attn_weights (T, S)).
    """
    H = packed["hidden_size"]
    V = packed["vocab_size"]
    LV = packed["w_out"].shape[1]
    BL = packed["bias"].shape[1]
    S = encoder_outputs.shape[0]
    T = input_ids.shape[0]

    ids = jnp.asarray(input_ids, jnp.int32).reshape(T)
    h0 = hidden.reshape(1, H).astype(jnp.float32)
    enc = encoder_outputs.astype(jnp.float32)

    resident2d = lambda bs: pl.BlockSpec(bs, lambda t, ids: (0, 0))

    grid_spec = pltpu.PrefetchScalarGridSpec(
        num_scalar_prefetch=1,
        grid=(T,),
        in_specs=[
            pl.BlockSpec((1, 1, H), lambda t, ids: (ids[t], 0, 0)),   # embedding gather
            resident2d((1, H)),                                       # h0
            resident2d((S, H)),                                       # encoder outputs
            resident2d((H, H)),                                       # wce
            resident2d((H, H)),                                       # wca
            resident2d((H, 3 * H)),                                   # wgi
            resident2d((H, 3 * H)),                                   # wgh
            resident2d((H, LV)),                                      # w_out
            resident2d((4, BL)),                                      # bias slab
        ],
        out_specs=[
            pl.BlockSpec((1, 8, LV), lambda t, ids: (t, 0, 0)),       # per-step log-probs
            pl.BlockSpec((1, H), lambda t, ids: (0, 0)),              # final hidden
        ],
        scratch_shapes=[pltpu.VMEM((1, H), jnp.float32),              # hidden carry
                        pltpu.VMEM((1, H), jnp.float32)],             # context (mean enc)
    )

    logp_slab, h_final = pl.pallas_call(
        decoder_kernel,
        out_shape=(jax.ShapeDtypeStruct((T, 8, LV), jnp.float32),
                   jax.ShapeDtypeStruct((1, H), jnp.float32)),
        grid_spec=grid_spec,
        compiler_params=pltpu.CompilerParams(
            dimension_semantics=("arbitrary",),        # sequential: hidden-state carry
            vmem_limit_bytes=48 * 1024 * 1024),        # > 16/32 MiB defaults, < 64 MiB v7x
    )(ids, packed["emb3d"], h0, enc, packed["wce"], packed["wca"],
      packed["wgi"], packed["wgh"], packed["w_out"], packed["bias"])

    logp = logp_slab[:, 0, :V]                                        # (T, V)
    # Attention weights are the data-independent constant 1/S (see kernel note).
    aw = jnp.full((T, S), 1.0 / S, jnp.float32)
    return logp, h_final.reshape(1, 1, H), aw


def attn_decoder_forward(packed, input_idx, hidden, encoder_outputs):
    """Single-step forward, matching AttnDecoderRNN.forward (eval mode)."""
    ids = jnp.asarray([input_idx], jnp.int32)
    logp, h_new, aw = attn_decoder_decode(packed, ids, hidden, encoder_outputs)
    return logp[0:1], h_new, aw[0:1]


def _reference_forward(params, input_idx, hidden, encoder_outputs):
    """Pure-JAX reference running the FULL original module recipe (f32 activations;
    weights round-tripped through bf16, matching the values the kernel sees)."""
    q = lambda w: w.astype(jnp.bfloat16).astype(jnp.float32)
    dot = lambda a, b: jnp.dot(a, b, precision=lax.Precision.HIGHEST)
    H = params["wc_e"].shape[0]
    S = encoder_outputs.shape[0]
    emb = params["embedding"][input_idx].reshape(1, H)
    hid = hidden.reshape(1, H)
    # original attention recipe: single scalar score broadcast over the sequence
    w = dot(emb, params["wa_e"]) + dot(hid, params["wa_h"]) + params["ba"]
    aw = jax.nn.softmax(jnp.broadcast_to(w, (1, S)), axis=-1)
    attn_applied = dot(aw, encoder_outputs)
    x = jax.nn.relu(dot(emb, q(params["wc_e"])) + dot(attn_applied, q(params["wc_a"]))
                    + params["bc"])
    r = jax.nn.sigmoid(dot(x, q(params["wir"])) + params["bir"]
                       + dot(hid, q(params["whr"])) + params["bhr"])
    z = jax.nn.sigmoid(dot(x, q(params["wiz"])) + params["biz"]
                       + dot(hid, q(params["whz"])) + params["bhz"])
    n = jnp.tanh(dot(x, q(params["win"])) + params["bn"]
                 + r * (dot(hid, q(params["whn"])) + params["bhn"]))
    hnew = (1.0 - z) * n + z * hid
    out = jax.nn.log_softmax(dot(hnew, q(params["wout"])) + params["bout"], axis=-1)
    return out, hnew.reshape(1, 1, H), aw


def init_params(key, hidden_size, output_size):
    H, V = hidden_size, output_size
    ks = jax.random.split(key, 24)
    u = lambda k, shape, scale: jax.random.uniform(k, shape, jnp.float32, -scale, scale)
    s_lin2 = 1.0 / jnp.sqrt(2.0 * H)
    s_lin1 = 1.0 / jnp.sqrt(1.0 * H)
    return {
        "embedding": jax.random.normal(ks[0], (V, H), jnp.float32),
        # attn: Linear(2H -> 1), weight split into embedded-half / hidden-half (transposed)
        "wa_e": u(ks[1], (H, 1), s_lin2), "wa_h": u(ks[2], (H, 1), s_lin2),
        "ba": u(ks[3], (1, 1), s_lin2),
        # attn_combine: Linear(2H -> H), split likewise
        "wc_e": u(ks[4], (H, H), s_lin2), "wc_a": u(ks[5], (H, H), s_lin2),
        "bc": u(ks[6], (1, H), s_lin2),
        # GRU(H -> H): gate weights pre-transposed to (in, out)
        "wir": u(ks[7], (H, H), s_lin1), "wiz": u(ks[8], (H, H), s_lin1),
        "win": u(ks[9], (H, H), s_lin1),
        "whr": u(ks[10], (H, H), s_lin1), "whz": u(ks[11], (H, H), s_lin1),
        "whn": u(ks[12], (H, H), s_lin1),
        # "bn" = GRU input n-gate bias (PyTorch b_in)
        "bir": u(ks[13], (1, H), s_lin1), "biz": u(ks[14], (1, H), s_lin1),
        "bn": u(ks[15], (1, H), s_lin1),
        "bhr": u(ks[16], (1, H), s_lin1), "bhz": u(ks[17], (1, H), s_lin1),
        "bhn": u(ks[18], (1, H), s_lin1),
        # out: Linear(H -> V), transposed
        "wout": u(ks[19], (H, V), s_lin1), "bout": u(ks[20], (1, V), s_lin1),
    }


if __name__ == "__main__":
    hidden_size = 32
    output_size = 64   # vocab size
    seq_len = 8
    num_steps = 5      # T teacher-forced decode steps inside one kernel launch

    key = jax.random.PRNGKey(0)
    kp, ki, kh, ke = jax.random.split(key, 4)

    params = init_params(kp, hidden_size, output_size)
    packed = pack_params(params)    # fuse/pad/quantize once, reused for every decode

    input_ids = jax.random.randint(ki, (num_steps,), 0, output_size, dtype=jnp.int32)
    hidden = jax.random.normal(kh, (1, 1, hidden_size), jnp.float32)
    encoder_outputs = jax.random.normal(ke, (seq_len, hidden_size), jnp.float32)

    # --- fused multi-step decode (one kernel launch, weights VMEM-resident) ---
    logp, h_final, aw = attn_decoder_decode(packed, input_ids, hidden, encoder_outputs)
    jax.block_until_ready((logp, h_final, aw))

    # --- pure-JAX reference: full original recipe, one step at a time ---
    h_ref = hidden
    ref_outs, ref_aws = [], []
    for t in range(num_steps):
        o, h_ref, a = _reference_forward(params, int(input_ids[t]), h_ref, encoder_outputs)
        ref_outs.append(o)
        ref_aws.append(a)
    r_logp = jnp.concatenate(ref_outs, axis=0)
    r_aw = jnp.concatenate(ref_aws, axis=0)

    assert logp.shape == (num_steps, output_size)
    assert h_final.shape == (1, 1, hidden_size)
    assert aw.shape == (num_steps, seq_len)
    # Tolerance sized for the kernel's bf16 activation/weight MXU path vs the
    # f32-activation reference (accumulated over num_steps carried hidden states).
    assert jnp.allclose(logp, r_logp, atol=5e-2), "log_softmax outputs mismatch"
    assert jnp.allclose(h_final, h_ref, atol=5e-2), "final hidden mismatch"
    assert jnp.allclose(aw, r_aw, atol=1e-6), "attn_weights mismatch"

    # --- single-step path: exact AttnDecoderRNN.forward semantics ---
    out1, h1, aw1 = attn_decoder_forward(packed, int(input_ids[0]), hidden, encoder_outputs)
    jax.block_until_ready((out1, h1, aw1))
    assert out1.shape == (1, output_size)
    assert h1.shape == (1, 1, hidden_size)
    assert aw1.shape == (1, seq_len)
    assert jnp.allclose(out1, r_logp[0:1], atol=5e-2), "single-step output mismatch"

    print("KERNEL_OK")
</pallas_src>

<mosaic_0001>
module attributes {stable_mosaic.version = 11 : i64} {
  func.func @decoder_kernel(%arg0: i32, %arg1: memref<5xi32, #tpu.memory_space<smem>>, %arg2: memref<1x1x32xf32, #tpu.memory_space<vmem>>, %arg3: memref<1x32xf32, #tpu.memory_space<vmem>>, %arg4: memref<8x32xf32, #tpu.memory_space<vmem>>, %arg5: memref<32x32xbf16, #tpu.memory_space<vmem>>, %arg6: memref<32x32xbf16, #tpu.memory_space<vmem>>, %arg7: memref<32x96xbf16, #tpu.memory_space<vmem>>, %arg8: memref<32x96xbf16, #tpu.memory_space<vmem>>, %arg9: memref<32x128xbf16, #tpu.memory_space<vmem>>, %arg10: memref<4x128xf32, #tpu.memory_space<vmem>>, %arg11: memref<1x8x128xf32, #tpu.memory_space<vmem>>, %arg12: memref<1x32xf32, #tpu.memory_space<vmem>>, %arg13: memref<1x32xf32, #tpu.memory_space<vmem>>, %arg14: memref<1x32xf32, #tpu.memory_space<vmem>>) attributes {dimension_semantics = [#tpu.dimension_semantics<arbitrary>], iteration_bounds = array<i64: 5>, scalar_prefetch = 1 : i64, scratch_operands = 2 : i64, tpu.core_type = #tpu.core_type<tc>, window_params = [{transform_indices = @transform_0, window_bounds = array<i64: 1, 1, 32>}, {pipeline_mode = #tpu.pipeline_mode<synchronous>, transform_indices = @transform_1, window_bounds = array<i64: 1, 32>}, {pipeline_mode = #tpu.pipeline_mode<synchronous>, transform_indices = @transform_2, window_bounds = array<i64: 8, 32>}, {pipeline_mode = #tpu.pipeline_mode<synchronous>, transform_indices = @transform_3, window_bounds = array<i64: 32, 32>}, {pipeline_mode = #tpu.pipeline_mode<synchronous>, transform_indices = @transform_4, window_bounds = array<i64: 32, 32>}, {pipeline_mode = #tpu.pipeline_mode<synchronous>, transform_indices = @transform_5, window_bounds = array<i64: 32, 96>}, {pipeline_mode = #tpu.pipeline_mode<synchronous>, transform_indices = @transform_6, window_bounds = array<i64: 32, 96>}, {pipeline_mode = #tpu.pipeline_mode<synchronous>, transform_indices = @transform_7, window_bounds = array<i64: 32, 128>}, {pipeline_mode = #tpu.pipeline_mode<synchronous>, transform_indices = @transform_8, window_bounds = array<i64: 4, 128>}, {transform_indices = @transform_9, window_bounds = array<i64: 1, 8, 128>}, {pipeline_mode = #tpu.pipeline_mode<synchronous>, transform_indices = @transform_10, window_bounds = array<i64: 1, 32>}]} {
    %c0_i32 = arith.constant 0 : i32
    %0 = arith.cmpi eq, %arg0, %c0_i32 : i32
    %1 = arith.extui %0 : i1 to i32
    %c0_i32_0 = arith.constant 0 : i32
    %2 = arith.cmpi ne, %1, %c0_i32_0 : i32
    scf.if %2 {
      %c0_39 = arith.constant 0 : index
      %c0_40 = arith.constant 0 : index
      %75 = vector.load %arg3[%c0_39, %c0_40] : memref<1x32xf32, #tpu.memory_space<vmem>>, vector<1x32xf32>
      %c0_41 = arith.constant 0 : index
      %c0_42 = arith.constant 0 : index
      %76 = vector.load %arg13[%c0_41, %c0_42] : memref<1x32xf32, #tpu.memory_space<vmem>>, vector<1x32xf32>
      tpu.vector_store %arg13[%c0_41, %c0_42], %75 {strides = array<i32>} : memref<1x32xf32, #tpu.memory_space<vmem>>, vector<1x32xf32>,
      %c0_43 = arith.constant 0 : index
      %c0_44 = arith.constant 0 : index
      %77 = vector.load %arg4[%c0_43, %c0_44] : memref<8x32xf32, #tpu.memory_space<vmem>>, vector<8x32xf32>
      %cst_45 = arith.constant dense<0.000000e+00> : vector<32xf32>
      %78 = vector.multi_reduction <add>, %77, %cst_45 [0] : vector<8x32xf32> to vector<32xf32>
      %79 = vector.shape_cast %78 : vector<32xf32> to vector<1x32xf32>
      %cst_46 = arith.constant 1.250000e-01 : f32
      %80 = vector.broadcast %cst_46 : f32 to vector<1x32xf32>
      %81 = arith.mulf %79, %80 : vector<1x32xf32>
      %c0_47 = arith.constant 0 : index
      %c0_48 = arith.constant 0 : index
      %82 = vector.load %arg14[%c0_47, %c0_48] : memref<1x32xf32, #tpu.memory_space<vmem>>, vector<1x32xf32>
      tpu.vector_store %arg14[%c0_47, %c0_48], %81 {strides = array<i32>} : memref<1x32xf32, #tpu.memory_space<vmem>>, vector<1x32xf32>,
    } else {
    }
    %c0 = arith.constant 0 : index
    %c0_1 = arith.constant 0 : index
    %3 = vector.load %arg13[%c0, %c0_1] : memref<1x32xf32, #tpu.memory_space<vmem>>, vector<1x32xf32>
    %c0_2 = arith.constant 0 : index
    %c0_3 = arith.constant 0 : index
    %c0_4 = arith.constant 0 : index
    %4 = vector.load %arg2[%c0_2, %c0_3, %c0_4] : memref<1x1x32xf32, #tpu.memory_space<vmem>>, vector<1x1x32xf32>
    %5 = vector.shape_cast %4 : vector<1x1x32xf32> to vector<1x32xf32>
    %c0_5 = arith.constant 0 : index
    %c0_6 = arith.constant 0 : index
    %6 = vector.load %arg14[%c0_5, %c0_6] : memref<1x32xf32, #tpu.memory_space<vmem>>, vector<1x32xf32>
    %7 = arith.truncf %5 : vector<1x32xf32> to vector<1x32xbf16>
    %c0_7 = arith.constant 0 : index
    %c0_8 = arith.constant 0 : index
    %8 = vector.load %arg5[%c0_7, %c0_8] : memref<32x32xbf16, #tpu.memory_space<vmem>>, vector<32x32xbf16>
    %cst = arith.constant dense<0.000000e+00> : vector<1x32xf32>
    %9 = tpu.matmul %7, %8, %cst {dimension_numbers = #tpu.dot_dimension_numbers<[1], [0], [0], [1], [0, 0, 1, 1], [], []>} : vector<1x32xbf16>, vector<32x32xbf16>, vector<1x32xf32> -> vector<1x32xf32>
    %10 = arith.truncf %6 : vector<1x32xf32> to vector<1x32xbf16>
    %c0_9 = arith.constant 0 : index
    %c0_10 = arith.constant 0 : index
    %11 = vector.load %arg6[%c0_9, %c0_10] : memref<32x32xbf16, #tpu.memory_space<vmem>>, vector<32x32xbf16>
    %cst_11 = arith.constant dense<0.000000e+00> : vector<1x32xf32>
    %12 = tpu.matmul %10, %11, %cst_11 {dimension_numbers = #tpu.dot_dimension_numbers<[1], [0], [0], [1], [0, 0, 1, 1], [], []>} : vector<1x32xbf16>, vector<32x32xbf16>, vector<1x32xf32> -> vector<1x32xf32>
    %13 = arith.addf %9, %12 : vector<1x32xf32>
    %c0_12 = arith.constant 0 : index
    %c0_13 = arith.constant 0 : index
    %14 = vector.load %arg10[%c0_12, %c0_13] : memref<4x128xf32, #tpu.memory_space<vmem>>, vector<1x32xf32>
    %15 = arith.addf %13, %14 : vector<1x32xf32>
    %cst_14 = arith.constant 0.000000e+00 : f32
    %16 = vector.broadcast %cst_14 : f32 to vector<1x32xf32>
    %17 = arith.maximumf %15, %16 : vector<1x32xf32>
    %18 = arith.truncf %17 : vector<1x32xf32> to vector<1x32xbf16>
    %c0_15 = arith.constant 0 : index
    %c0_16 = arith.constant 0 : index
    %19 = vector.load %arg7[%c0_15, %c0_16] : memref<32x96xbf16, #tpu.memory_space<vmem>>, vector<32x96xbf16>
    %cst_17 = arith.constant dense<0.000000e+00> : vector<1x96xf32>
    %20 = tpu.matmul %18, %19, %cst_17 {dimension_numbers = #tpu.dot_dimension_numbers<[1], [0], [0], [1], [0, 0, 1, 1], [], []>} : vector<1x32xbf16>, vector<32x96xbf16>, vector<1x96xf32> -> vector<1x96xf32>
    %c1 = arith.constant 1 : index
    %c0_18 = arith.constant 0 : index
    %21 = vector.load %arg10[%c1, %c0_18] : memref<4x128xf32, #tpu.memory_space<vmem>>, vector<1x96xf32>
    %22 = arith.addf %20, %21 : vector<1x96xf32>
    %23 = arith.truncf %3 : vector<1x32xf32> to vector<1x32xbf16>
    %c0_19 = arith.constant 0 : index
    %c0_20 = arith.constant 0 : index
    %24 = vector.load %arg8[%c0_19, %c0_20] : memref<32x96xbf16, #tpu.memory_space<vmem>>, vector<32x96xbf16>
    %cst_21 = arith.constant dense<0.000000e+00> : vector<1x96xf32>
    %25 = tpu.matmul %23, %24, %cst_21 {dimension_numbers = #tpu.dot_dimension_numbers<[1], [0], [0], [1], [0, 0, 1, 1], [], []>} : vector<1x32xbf16>, vector<32x96xbf16>, vector<1x96xf32> -> vector<1x96xf32>
    %c2 = arith.constant 2 : index
    %c0_22 = arith.constant 0 : index
    %26 = vector.load %arg10[%c2, %c0_22] : memref<4x128xf32, #tpu.memory_space<vmem>>, vector<1x96xf32>
    %27 = arith.addf %25, %26 : vector<1x96xf32>
    %28 = vector.extract_strided_slice %22 {offsets = [0, 0], sizes = [1, 32], strides = [1, 1]} : vector<1x96xf32> to vector<1x32xf32>
    %29 = vector.extract_strided_slice %27 {offsets = [0, 0], sizes = [1, 32], strides = [1, 1]} : vector<1x96xf32> to vector<1x32xf32>
    %30 = arith.addf %28, %29 : vector<1x32xf32>
    %31 = arith.negf %30 : vector<1x32xf32>
    %32 = math.exp %31 : vector<1x32xf32>
    %cst_23 = arith.constant 1.000000e+00 : f32
    %33 = vector.broadcast %cst_23 : f32 to vector<1x32xf32>
    %34 = arith.addf %33, %32 : vector<1x32xf32>
    %35 = arith.divf %33, %34 : vector<1x32xf32>
    %36 = vector.extract_strided_slice %22 {offsets = [0, 32], sizes = [1, 32], strides = [1, 1]} : vector<1x96xf32> to vector<1x32xf32>
    %37 = vector.extract_strided_slice %27 {offsets = [0, 32], sizes = [1, 32], strides = [1, 1]} : vector<1x96xf32> to vector<1x32xf32>
    %38 = arith.addf %36, %37 : vector<1x32xf32>
    %39 = arith.negf %38 : vector<1x32xf32>
    %40 = math.exp %39 : vector<1x32xf32>
    %cst_24 = arith.constant 1.000000e+00 : f32
    %41 = vector.broadcast %cst_24 : f32 to vector<1x32xf32>
    %42 = arith.addf %41, %40 : vector<1x32xf32>
    %43 = arith.divf %41, %42 : vector<1x32xf32>
    %44 = vector.extract_strided_slice %22 {offsets = [0, 64], sizes = [1, 32], strides = [1, 1]} : vector<1x96xf32> to vector<1x32xf32>
    %45 = vector.extract_strided_slice %27 {offsets = [0, 64], sizes = [1, 32], strides = [1, 1]} : vector<1x96xf32> to vector<1x32xf32>
    %46 = arith.mulf %35, %45 : vector<1x32xf32>
    %47 = arith.addf %44, %46 : vector<1x32xf32>
    %48 = math.tanh %47 : vector<1x32xf32>
    %cst_25 = arith.constant 1.000000e+00 : f32
    %49 = vector.broadcast %cst_25 : f32 to vector<1x32xf32>
    %50 = arith.subf %49, %43 : vector<1x32xf32>
    %51 = arith.mulf %50, %48 : vector<1x32xf32>
    %52 = arith.mulf %43, %3 : vector<1x32xf32>
    %53 = arith.addf %51, %52 : vector<1x32xf32>
    %54 = arith.truncf %53 : vector<1x32xf32> to vector<1x32xbf16>
    %c0_26 = arith.constant 0 : index
    %c0_27 = arith.constant 0 : index
    %55 = vector.load %arg9[%c0_26, %c0_27] : memref<32x128xbf16, #tpu.memory_space<vmem>>, vector<32x128xbf16>
    %cst_28 = arith.constant dense<0.000000e+00> : vector<1x128xf32>
    %56 = tpu.matmul %54, %55, %cst_28 {dimension_numbers = #tpu.dot_dimension_numbers<[1], [0], [0], [1], [0, 0, 1, 1], [], []>} : vector<1x32xbf16>, vector<32x128xbf16>, vector<1x128xf32> -> vector<1x128xf32>
    %c3 = arith.constant 3 : index
    %c0_29 = arith.constant 0 : index
    %57 = vector.load %arg10[%c3, %c0_29] : memref<4x128xf32, #tpu.memory_space<vmem>>, vector<1x128xf32>
    %58 = arith.addf %56, %57 : vector<1x128xf32>
    %cst_30 = arith.constant dense<0xFF800000> : vector<1xf32>
    %59 = vector.multi_reduction <maximumf>, %58, %cst_30 [1] : vector<1x128xf32> to vector<1xf32>
    %60 = vector.shape_cast %59 : vector<1xf32> to vector<1x1xf32>
    %61 = vector.broadcast %60 : vector<1x1xf32> to vector<1x128xf32>
    %62 = arith.subf %58, %61 : vector<1x128xf32>
    %63 = math.exp %62 : vector<1x128xf32>
    %cst_31 = arith.constant dense<0.000000e+00> : vector<1xf32>
    %64 = vector.multi_reduction <add>, %63, %cst_31 [1] : vector<1x128xf32> to vector<1xf32>
    %65 = vector.shape_cast %64 : vector<1xf32> to vector<1x1xf32>
    %66 = math.log %65 : vector<1x1xf32>
    %67 = vector.broadcast %66 : vector<1x1xf32> to vector<1x128xf32>
    %68 = arith.subf %62, %67 : vector<1x128xf32>
    %c0_32 = arith.constant 0 : index
    %c0_33 = arith.constant 0 : index
    %69 = vector.load %arg13[%c0_32, %c0_33] : memref<1x32xf32, #tpu.memory_space<vmem>>, vector<1x32xf32>
    tpu.vector_store %arg13[%c0_32, %c0_33], %53 {strides = array<i32>} : memref<1x32xf32, #tpu.memory_space<vmem>>, vector<1x32xf32>,
    %c0_34 = arith.constant 0 : index
    %c0_35 = arith.constant 0 : index
    %70 = vector.load %arg12[%c0_34, %c0_35] : memref<1x32xf32, #tpu.memory_space<vmem>>, vector<1x32xf32>
    tpu.vector_store %arg12[%c0_34, %c0_35], %53 {strides = array<i32>} : memref<1x32xf32, #tpu.memory_space<vmem>>, vector<1x32xf32>,
    %71 = vector.shape_cast %68 : vector<1x128xf32> to vector<1x1x128xf32>
    %72 = vector.shape_cast %71 : vector<1x1x128xf32> to vector<1x1x128xf32>
    %73 = vector.broadcast %72 : vector<1x1x128xf32> to vector<1x8x128xf32>
    %c0_36 = arith.constant 0 : index
    %c0_37 = arith.constant 0 : index
    %c0_38 = arith.constant 0 : index
    %74 = vector.load %arg11[%c0_36, %c0_37, %c0_38] : memref<1x8x128xf32, #tpu.memory_space<vmem>>, vector<1x8x128xf32>
    tpu.vector_store %arg11[%c0_36, %c0_37, %c0_38], %73 {strides = array<i32>} : memref<1x8x128xf32, #tpu.memory_space<vmem>>, vector<1x8x128xf32>,
    return
  }
  func.func @transform_0(%arg0: i32, %arg1: memref<5xi32, #tpu.memory_space<smem>>) -> (i32, i32, i32) {
    %0 = arith.index_cast %arg0 : i32 to index
    %1 = memref.load %arg1[%0] : memref<5xi32, #tpu.memory_space<smem>>
    %c0_i32 = arith.constant 0 : i32
    %c0_i32_0 = arith.constant 0 : i32
    %c0_i32_1 = arith.constant 0 : i32
    return %1, %c0_i32, %c0_i32_0 : i32, i32, i32
  }
  func.func @transform_1(%arg0: i32, %arg1: memref<5xi32, #tpu.memory_space<smem>>) -> (i32, i32) {
    %c0_i32 = arith.constant 0 : i32
    %c0_i32_0 = arith.constant 0 : i32
    %c0_i32_1 = arith.constant 0 : i32
    return %c0_i32, %c0_i32_0 : i32, i32
  }
  func.func @transform_2(%arg0: i32, %arg1: memref<5xi32, #tpu.memory_space<smem>>) -> (i32, i32) {
    %c0_i32 = arith.constant 0 : i32
    %c0_i32_0 = arith.constant 0 : i32
    %c0_i32_1 = arith.constant 0 : i32
    return %c0_i32, %c0_i32_0 : i32, i32
  }
  func.func @transform_3(%arg0: i32, %arg1: memref<5xi32, #tpu.memory_space<smem>>) -> (i32, i32) {
    %c0_i32 = arith.constant 0 : i32
    %c0_i32_0 = arith.constant 0 : i32
    %c0_i32_1 = arith.constant 0 : i32
    return %c0_i32, %c0_i32_0 : i32, i32
  }
  func.func @transform_4(%arg0: i32, %arg1: memref<5xi32, #tpu.memory_space<smem>>) -> (i32, i32) {
    %c0_i32 = arith.constant 0 : i32
    %c0_i32_0 = arith.constant 0 : i32
    %c0_i32_1 = arith.constant 0 : i32
    return %c0_i32, %c0_i32_0 : i32, i32
  }
  func.func @transform_5(%arg0: i32, %arg1: memref<5xi32, #tpu.memory_space<smem>>) -> (i32, i32) {
    %c0_i32 = arith.constant 0 : i32
    %c0_i32_0 = arith.constant 0 : i32
    %c0_i32_1 = arith.constant 0 : i32
    return %c0_i32, %c0_i32_0 : i32, i32
  }
  func.func @transform_6(%arg0: i32, %arg1: memref<5xi32, #tpu.memory_space<smem>>) -> (i32, i32) {
    %c0_i32 = arith.constant 0 : i32
    %c0_i32_0 = arith.constant 0 : i32
    %c0_i32_1 = arith.constant 0 : i32
    return %c0_i32, %c0_i32_0 : i32, i32
  }
  func.func @transform_7(%arg0: i32, %arg1: memref<5xi32, #tpu.memory_space<smem>>) -> (i32, i32) {
    %c0_i32 = arith.constant 0 : i32
    %c0_i32_0 = arith.constant 0 : i32
    %c0_i32_1 = arith.constant 0 : i32
    return %c0_i32, %c0_i32_0 : i32, i32
  }
  func.func @transform_8(%arg0: i32, %arg1: memref<5xi32, #tpu.memory_space<smem>>) -> (i32, i32) {
    %c0_i32 = arith.constant 0 : i32
    %c0_i32_0 = arith.constant 0 : i32
    %c0_i32_1 = arith.constant 0 : i32
    return %c0_i32, %c0_i32_0 : i32, i32
  }
  func.func @transform_9(%arg0: i32, %arg1: memref<5xi32, #tpu.memory_space<smem>>) -> (i32, i32, i32) {
    %c0_i32 = arith.constant 0 : i32
    %c0_i32_0 = arith.constant 0 : i32
    %c0_i32_1 = arith.constant 0 : i32
    return %arg0, %c0_i32, %c0_i32_0 : i32, i32, i32
  }
  func.func @transform_10(%arg0: i32, %arg1: memref<5xi32, #tpu.memory_space<smem>>) -> (i32, i32) {
    %c0_i32 = arith.constant 0 : i32
    %c0_i32_0 = arith.constant 0 : i32
    %c0_i32_1 = arith.constant 0 : i32
    return %c0_i32, %c0_i32_0 : i32, i32
  }
}

</mosaic_0001>

<bundles_post_ra>
// kernel: tpu_custom_call.1
= control target key start
LH: loop header
LB: loop body
LE: loop exit
PB: predicated region body
PF: predicated region fallthrough
CT: control target
= control target key end

     0   :  { %s965_s20 = smov [#allocation5]   ;;  %s1193_s0 = inlined_call_operand.vmem [shape: s32[5], index: 0, kind: input, shape index: {}]   ;;  %s1194_s1 = inlined_call_operand.vmem [shape: f32[64,1,32], index: 1, kind: input, shape index: {}]   ;;  %s1195_s2 = inlined_call_operand.vmem [shape: f32[1,32], index: 2, kind: input, shape index: {}]   ;;  %s1196_s3 = inlined_call_operand.vmem [shape: f32[8,32], index: 3, kind: input, shape index: {}]   ;;  %s1197_s4 = inlined_call_operand.vmem [shape: bf16[32,32], index: 4, kind: input, shape index: {}]   ;;  %s1198_s5 = inlined_call_operand.vmem [shape: bf16[32,32], index: 5, kind: input, shape index: {}]   ;;  %s1199_s6 = inlined_call_operand.vmem [shape: bf16[32,96], index: 6, kind: input, shape index: {}]   ;;  %s1200_s7 = inlined_call_operand.vmem [shape: bf16[32,96], index: 7, kind: input, shape index: {}]   ;;  %s1201_s8 = inlined_call_operand.vmem [shape: bf16[32,128], index: 8, kind: input, shape index: {}]   ;;  %s1202_s9 = inlined_call_operand.vmem [shape: f32[4,128], index: 9, kind: input, shape index: {}]   ;;  %s1203_s10 = inlined_call_operand.hbm [shape: f32[5,8,128], index: 10, kind: output, shape index: {0}]   ;;  %s1204_s11 = inlined_call_operand.hbm [shape: f32[1,32], index: 11, kind: output, shape index: {1}]  }
   0x1   :  { %1206 = sst [smem:[#allocation13_spill]] %s1194_s1  ;;  %s18_s19 = sshll.u32 %s1193_s0, 4  ;;  %s19_s19 = int_to_ptr.vmem [resolvable:$true] %s18_s19 }
   0x2   :  { %1207 = sst [smem:[#allocation14_spill]] %s1195_s2 }
   0x3   :  { %21 = dma.vmem_to_smem %s19_s19, 16, %s965_s20, [#allocation4] }
   0x4   :  { %939 = dma.done.wait [#allocation4], 16 }
   0x5   :  { %940 = vsyncadd [#allocation4], 4294967280 }
   0x6   :  { %24 = sfence }
   0x7   :  { %25 = vsyncpa [#allocation7], 0 }
   0x8   :  { %27 = vsyncpa [#allocation7 + $0x1], 0 }
   0x9   :  { %28 = vsyncpa [#allocation9], 0  ;;  %s1033_s21 = smov 0   ;;  %s1035_s22 = smov 0  }
   0xa   :  { %s1037_s23 = smov 0   ;;  %s1039_s24 = smov 0  }
   0xb LB: > { %s1054_s0 = sadd.s32 4294967295, %s963_s24   ;;  %s726_s25 = sadd.s32 4294967294, %s963_s24   ;;  %s963_s24 = sphi %s1039_s24, %s1218_s24   ;;  %s959_s23 = sphi %s1037_s23, %s1217_s23   ;;  %s955_s22 = sphi %s1035_s22, %s1216_s22   ;;  %s951_s21 = sphi %s1033_s21, %s1215_s21  }
   0xc   : > { %s1058_s26 = sadd.s32 1, %s963_s24   ;;  %s237_s27 = sadd.s32 1, %s959_s23 }
   0xd   : > { %s234_s28 = ssub.s32 %s963_s24, %s1058_s26  ;;  %p247_p0 = scmp.ne.s32.totalorder %s959_s23, %s955_s22 }
   0xe   : > { %p235_p1 = scmp.eq.s32.totalorder %s234_s28, 0  ;;  %p248_p2 = scmp.eq.s32.totalorder %s1054_s0, 4 }
   0xf   : > { %p253_p3 = scmp.ne.s32.totalorder %s955_s22, %s951_s21  ;;  %p254_p4 = scmp.eq.s32.totalorder %s726_s25, 4 }
  0x10   : > { %s1069_s29 = scalar_select %p235_p1, %s959_s23, %s237_s27  }
  0x11   : > { %p1073_p5 = por %p248_p2, %p247_p0  ;;  %p1077_p6 = por %p254_p4, %p253_p3 }
  0x12   : > { %p729_p7 = scmp.ge.s32.totalorder %s963_s24, 1  ;;  %p325_p8 = scmp.lt.s32.totalorder %s963_s24, 6 }
  0x14   : > { %p326_p9 = pnand %p729_p7, %p325_p8 }
  0x15   : > { %s1205_s13 = sand.u32 (!%p326_p9), 1, %s955_s22   ;;  %s362_s14 = sld [smem:[#allocation5 + %s1054_s0]] (!%p326_p9) }
  0x16   : > { %329 = sbr.rel (%p326_p9) target bundleno = 1093 (0x445), region = 56  ;;  %s1087_s15 = sshll.u32 (!%p326_p9), %s1205_s13, 3 }
  0x17   : > { %s1210_s1 = sld [smem:[#allocation13_spill]] (!%p326_p9)  ;;  %p731_p11 = scmp.ne.s32.totalorder (!%p326_p9), %s1054_s0, 0 }
  0x1b   : > { %p363_p10 = scmp.lt.s32.totalorder %s362_s14, 63  ;;  %371 = sbr.rel (%p731_p11) target bundleno = 49 (0x31), region = 60 }
  0x1c   : > { %s1211_s2 = sld [smem:[#allocation14_spill]] (!%p731_p11) }
  0x1d   : > { %s1220_s14 = smov (!%p363_p10, %s362_s14), 63 }
  0x1e   : > { %s365_s18 = scalar_lea.vmem %s1210_s1, %s1220_s14 }
  0x20   : > { %vm373_vm0 = vcmask 253952   ;;  %v375_v1 = vld [vmem:[%s1196_s3] sm:$0xff]  ;;  %vm376_vm1 = vcmask 261120  }
  0x21   : > { %v377_v2 = vsel %vm376_vm1, %v375_v1, 0.0 }
  0x22   : > { %v372_v0 = vld [vmem:[%s1211_s2] sm:$0x1]  ;;  %v378_v3 = vrot.slane %v377_v2, 4 }
  0x23   : > { %374 = vst.msk [vmem:[#allocation2] sm:$0x1] %vm373_vm0, %v372_v0 }
  0x24   : > { %v379_v4 = vadd.f32 %v378_v3, %v377_v2 }
  0x26   : > { %v380_v5 = vrot.slane %v379_v4, 2 }
  0x28   : > { %v381_v6 = vadd.f32 %v380_v5, %v379_v4 }
  0x2a   : > { %v382_v7 = vrot.slane %v381_v6, 1 }
  0x2c   : > { %v383_v8 = vadd.f32 %v382_v7, %v381_v6 }
  0x2e   : > { %v384_v9 = vmul.f32 0.125, %v383_v8 }
  0x30   : > { %385 = vst.msk [vmem:[#allocation3] sm:$0x1] %vm373_vm0, %v384_v9 }
  0x31 PF: > { %v787_v10 = vld [vmem:[%s1198_s5 + $0x8] sm:$0xff]  ;;  %v786_v12 = vld [vmem:[%s1198_s5] sm:$0xff]  ;;  %vm411_vm2 = vcmask 261120   ;;  %s966_s28 = smov 64   ;;  %s967_s1 = smov 96   ;;  %vm625_vm7 = vcmask 253952  }
  0x32   : > { %v785_v11 = vld [vmem:[%s1197_s4 + $0x8] sm:$0xff]  ;;  %v784_v13 = vld [vmem:[%s1197_s4] sm:$0xff]  ;;  %421 = vmatpush.bf16.msra.mxu0 %v787_v10  ;;  %s968_s13 = smov 32   ;;  %vm608_vm8 = vcmask 1040384   ;;  %s1212_s25 = scalar_lea.vmem [#allocation6], %s1087_s15 }
  0x33   : > { %449 = vmatpush.bf16.msra.mxu1 %v785_v11  ;;  %v387_v15 = vld [vmem:[%s365_s18] sm:$0x1]  ;;  %v791_v16 = vld [vmem:[%s1200_s7 + $0x8] sm:$0xff]  ;;  %v498_v31 = vld [vmem:[%s1202_s9 + $0x2] sm:$0x1]  ;;  %s779_s18 = sshll.u32 %s1054_s0, 3  ;;  %s1213_s16 = smov %s1212_s25 }
  0x34   : > { %520 = vmatpush.bf16.msra.mxu3 %v791_v16  ;;  %v790_v17 = vld [vmem:[%s1200_s7] sm:$0xff]  ;;  %v389_v20 = vpack.c.bf16 %v387_v15, %v387_v15  ;;  %v789_v22 = vld [vmem:[%s1199_s6 + $0x8] sm:$0xff]  ;;  %s641_s20 = scalar_lea.hbm %s1203_s10, %s779_s18  ;;  %s643_s27 = sshll.u32 %s1212_s25, 4  ;;  %s644_s27 = int_to_ptr.vmem [resolvable:$true] %s643_s27 }
  0x35   : > { %v386_v18 = vld [vmem:[#allocation2] sm:$0x1]  ;;  %486 = vmatpush.bf16.msra.mxu2 %v789_v22  ;;  %v464_v37 = vld [vmem:[%s1202_s9 + $0x1] sm:$0x1]  ;;  %v793_v61 = vld [vmem:[%s1201_s8 + $0x8] sm:$0xff]  ;;  %s915_s17 = scalar_lea.hbm %s1203_s10, 40 }
  0x36   : > { %422 = vmatpush.bf16.msra.mxu0 %v786_v12  ;;  %v493_v21 = vpack.c.bf16 %v386_v18, %v386_v18  ;;  %v788_v23 = vld [vmem:[%s1199_s6] sm:$0xff] }
  0x37   : > { %v388_v14 = vld [vmem:[#allocation3] sm:$0x1]  ;;  %450 = vmatpush.bf16.msra.mxu1 %v784_v13  ;;  %v456_v26 = vld [vmem:[%s1202_s9] sm:$0x1]  ;;  %v576_v8 = vld [vmem:[%s1202_s9 + $0x3] sm:$0x1] }
  0x38   : > { %v394_v19 = vpack.c.bf16 %v388_v14, %v388_v14  ;;  %521 = vmatpush.bf16.msra.mxu3 %v790_v17  ;;  %v844_v60 = vld [vmem:[#allocation2] ss:$0 sm:$0xff] }
  0x39   : > { %487 = vmatpush.bf16.msra.mxu2 %v788_v23  ;;  %v792_v62 = vld [vmem:[%s1201_s8] sm:$0xff] }
  0x3a   : > { %740 = vmatmul.msk.bf16.vlgmr.msra.gmra.mxu0 %vm411_vm2, %v394_v19  ;;  %749 = vmatmul.msk.bf16.vlgmr.msra.gmra.mxu1 %vm411_vm2, %v389_v20 }
  0x3b   : > { %767 = vmatmul.msk.bf16.vlgmr.msra.gmra.mxu3 %vm411_vm2, %v493_v21  ;;  %601 = vmatpush.bf16.msrb.mxu0 %v793_v61 }
  0x3f   : > { %602 = vmatpush.bf16.msrb.mxu0 %v792_v62 }
  0xb7   : > { %v424_v24 = vpop.f32.mrf.mxu0  ;;  %v452_v25 = vpop.f32.mrf.mxu1 }
  0xb8   : > { %v453_v27 = vadd.f32 %v452_v25, %v424_v24 }
  0xba   : > { %v457_v28 = vadd.f32 %v456_v26, %v453_v27 }
  0xbc   : > { %v458_v29 = vmax.f32 %v457_v28, 0.0 }
  0xbe   : > { %v459_v30 = vpack.c.bf16 %v458_v29, %v458_v29  ;;  %v523_v34 = vpop.f32.mrf.mxu3 }
  0xbf   : > { %v426_v32 = vpop.f32.mrf.mxu0  ;;  %v454_v33 = vpop.f32.mrf.mxu1  ;;  %v524_v35 = vadd.f32 %v523_v34, %v498_v31 }
  0xc0   : > { %758 = vmatmul.msk.bf16.vlgmr.msra.gmra.mxu2 %vm411_vm2, %v459_v30 }
  0xc1   : > { %548 = vrot.lane.b32.xlu0 %v524_v35, %s966_s28 }
  0xc6   : > { %v525_v36 = vpop.f32.mrf.mxu3 }
 0x133   : > { %v549_v52 = vpop.permute.xlu0 %548 }
 0x143   : > { %v489_v38 = vpop.f32.mrf.mxu2 }
 0x144   : > { %v490_v39 = vadd.f32 %v489_v38, %v464_v37 }
 0x146   : > { %v527_v40 = vadd.f32 %v524_v35, %v490_v39 }
 0x148   : > { %v768_v41 = vmul.f32 -1.442695, %v527_v40 }
 0x14a   : > { %845 = vpow2.f32 %v768_v41 }
 0x14b   : > { %v491_v42 = vpop.f32.mrf.mxu2 }
 0x150   : > { %v846_v43 = vpop.eup %845 }
 0x151   : > { %v531_v44 = vadd.f32 1.0, %v846_v43 }
 0x153   : > { %847 = vrcp.f32 %v531_v44  ;;  %v543_v48 = vand.u32 2147483648, %v531_v44  ;;  %v541_v50 = vand.u32 2147483647, %v531_v44  ;;  %vm537_vm4 = vweird.f32 %v531_v44 }
 0x155   : > { %v544_v53 = vor.u32 1.1754944e-38, %v543_v48  ;;  %vm542_vm6 = vcmp.eq.f32.partialorder %v541_v50, 8.507059e+37 }
 0x159   : > { %v848_v45 = vpop.eup %847 }
 0x15a   : > { %v533_v46 = vmul.f32 %v848_v45, %v531_v44  ;;  %vm538_vm3 = vweird.f32 %v848_v45 }
 0x15b   : > { %vm539_vm5 = vmor %vm537_vm4, %vm538_vm3 }
 0x15c   : > { %v534_v47 = vsub.f32 1.0, %v533_v46 }
 0x15e   : > { %v535_v49 = vmul.f32 %v848_v45, %v534_v47 }
 0x160   : > { %v536_v51 = vadd.f32 %v848_v45, %v535_v49 }
 0x162   : > { %v540_v54 = vsel %vm539_vm5, %v848_v45, %v536_v51 }
 0x163   : > { %v545_v55 = vsel %vm542_vm6, %v544_v53, %v540_v54 }
 0x164   : > { %v551_v56 = vmul.f32 %v549_v52, %v545_v55  ;;  %v558_v0 = vsub.f32 1.0, %v545_v55 }
 0x166   : > { %553 = vrot.lane.b32.xlu0 %v551_v56, %s966_s28  ;;  %s969_s28 = smov [#allocation8]  }
 0x167   : > { %s655_s14 = sshll.u32 %s969_s28, 4  ;;  %s645_s28 = sshll.u32 %s641_s20, 4  ;;  %s656_s14 = int_to_ptr.vmem [resolvable:$true] %s655_s14  ;;  %s646_s28 = int_to_ptr.hbm [resolvable:$true] %s645_s28 }
 0x1d8   : > { %v554_v57 = vpop.permute.xlu0 %553 }
 0x1d9   : > { %v556_v58 = vadd.f32 %v554_v57, %v490_v39 }
 0x1db   : > { %849 = vtanh.f32 %v556_v58 }
 0x1e1   : > { %v850_v59 = vpop.eup %849 }
 0x1e2   : > { %560 = vrot.lane.b32.xlu1 %v850_v59, %s967_s1 }
 0x1ea   : > { %566 = vrot.lane.b32.xlu1 %v844_v60, %s968_s13  ;;  %s657_s13 = sshll.u32 %s1204_s11, 4  ;;  %s658_s13 = int_to_ptr.hbm [resolvable:$true] %s657_s13 }
 0x254   : > { %v561_v63 = vpop.permute.xlu1 %560 }
 0x255   : > { %v563_v2 = vmul.f32 %v561_v63, %v558_v0 }
 0x25c   : > { %v567_v1 = vpop.permute.xlu1 %566 }
 0x25d   : > { %v569_v3 = vmul.f32 %v567_v1, %v545_v55 }
 0x25f   : > { %v570_v4 = vadd.f32 %v569_v3, %v563_v2 }
 0x261   : > { %622 = vrot.lane.b32.xlu1 %v570_v4, %s967_s1  ;;  %v571_v5 = vpack.c.bf16 %v570_v4, %v570_v4 }
 0x263   : > { %578 = vrot.lane.b32.xlu2 %v571_v5, %s967_s1 }
 0x2bd   : > { %v579_v6 = vpop.permute.xlu2 %578 }
 0x2be   : > { %777 = vmatmul.msk.bf16.vlgmr.msrb.gmra.mxu0 %vm411_vm2, %v579_v6 }
 0x2d3   : > { %v623_v7 = vpop.permute.xlu1 %622 }
 0x2d4   : > { %626 = vst.msk [vmem:[#allocation2] sm:$0x1] %vm625_vm7, %v623_v7 }
 0x2d5   : > { %627 = vst.msk [vmem:[#allocation8] sm:$0x1] %vm625_vm7, %v623_v7 }
 0x2d6   : > { %796 = dma.vmem_to_hbm [thread:$0]  (%p248_p2), %s656_s14, 16, %s658_s13, [#allocation9]  }
 0x2d7   : > { %s1214_s14 = sand.u32 1, %s955_s22   ;;  %s909_s13 = sshra.s32 %s646_s28, 4  ;;  %s910_s13 = int_to_ptr.hbm [resolvable:$true] %s909_s13 }
 0x2d8   : > { %s631_s1 = scalar_lea.sflag [#allocation7], %s1214_s14  ;;  %s911_s2 = scalar_lea.hbm %s910_s13, 8 }
 0x2d9   : > { %p912_p12 = scmp.ne.s32.totalorder %s910_s13, %s911_s2  ;;  %p916_p1 = scmp.lt.s32.totalorder %s910_s13, %s1203_s10 }
 0x2da   : > { %p917_p3 = scmp.lt.s32.totalorder %s915_s17, %s911_s2 }
 0x2db   : > { %p913_p13 = pnand %p912_p12, %p1073_p5 }
 0x2dc   : > { %p918_p4 = por %p917_p3, %p916_p1 }
 0x2dd   : > { %p914_p0 = pneg %p913_p13 }
 0x2df   : > { %p919_p7 = pnand %p918_p4, %p914_p0 }
 0x33b   : > { %v604_v9 = vpop.f32.mrf.mxu0 }
 0x33c   : > { %v605_v10 = vadd.f32 %v604_v9, %v576_v8 }
 0x33e   : > { %v609_v11 = vsel %vm608_vm8, %v605_v10, -inf }
 0x33f   : > { %610 = vmax.xlane.f32.xlu2 %v609_v11 }
 0x343   : > { %v606_v12 = vpop.f32.mrf.mxu0 }
 0x3b2   : > { %v611_v13 = vpop.xlane.xlu2 %610 }
 0x3b3   : > { %v612_v14 = vsub.f32 %v605_v10, %v611_v13 }
 0x3b5   : > { %v613_v15 = vmul.f32 1.442695, %v612_v14 }
 0x3b7   : > { %851 = vpow2.f32 %v613_v15 }
 0x3bd   : > { %v852_v16 = vpop.eup %851 }
 0x3be   : > { %v615_v17 = vsel %vm608_vm8, %v852_v16, 0.0 }
 0x3bf   : > { %616 = vadd.xlane.f32.xlu0 %v615_v17 }
 0x432   : > { %v617_v18 = vpop.xlane.xlu0 %616 }
 0x433   : > { %853 = vlog2.f32 %v617_v18 }
 0x439   : > { %v854_v19 = vpop.eup %853 }
 0x43a   : > { %v619_v20 = vmul.f32 0.6931472, %v854_v19 }
 0x43c   : > { %v620_v21 = vsub.f32 %v612_v14, %v619_v20 }
 0x43e   : > { %v628_v22 = vperm.slane %v620_v21, 0 }
 0x440   : > { %629 = vst [vmem:[%s1213_s16] sm:$0xff] %v628_v22 }
 0x441   : > { %922 = shalt.err (!%p919_p7)
}
 0x442   : > { %794 = dma.vmem_to_hbm [thread:$0]  (%p1073_p5), %s644_s27, 128, %s646_s28, %s631_s1  }
 0x443   : > { %942 = dma.done.wait (%p248_p2), [#allocation9], 16  }
 0x444   : > { %944 = vsyncadd (%p248_p2), [#allocation9], 4294967280 }
 0x445 PF: > { %p806_p8 = scmp.ge.s32.totalorder %s963_s24, 2  ;;  %s674_s15 = sand.u32 1, %s951_s21  }
 0x446   : > { %s675_s2 = scalar_lea.sflag [#allocation7], %s674_s15 }
 0x447   : > { %p801_p9 = pnand %p806_p8, %p1077_p6 }
 0x449   : > { %p802_p10 = pneg %p801_p9 }
 0x44b   : > { %946 = dma.done.wait (%p802_p10), %s675_s2, 128  }
 0x44c   : > { %948 = vsyncadd (%p802_p10), %s675_s2, 4294967168  ;;  %p31_p5 = scmp.ge.s32.totalorder %s1058_s26, 7   ;;  %s1215_s21 = smov %s955_s22 }
 0x44d   : > { %s1216_s22 = smov %s959_s23  ;;  %s1217_s23 = smov %s1069_s29 }
 0x44e   : > { %s1218_s24 = smov %s1058_s26  ;;  %33 = sbr.rel (!%p31_p5) target bundleno = 11 (0xb), region = 103 }
 0x453   :  { %681 = vsyncpa [#allocation7], 1 }
 0x454   :  { %683 = vsyncpa [#allocation7 + $0x1], 1 }
 0x455   :  { %684 = vsyncpa [#allocation9], 1 }

</bundles_post_ra>
